<compile_context>
chip_gen: v5e
topology: v5e:2x2
jax: 0.10.0
libtpu: 0.0.40
codegen_flags: <defaults>
</compile_context>

<pallas_src>
import math
import jax
import jax.numpy as jnp
from jax.experimental import pallas as pl
from jax.experimental.pallas import tpu as pltpu


def _conv1x1_kernel(w_ref, x_ref, o_ref):
    # w_ref: (C, C) weights in SMEM, layout (out_ch, in_ch) -- read as scalars.
    # x_ref / o_ref: (Nb, C, R, L) VMEM slabs; (R, L) are the dense tiled dims.
    c = x_ref.shape[1]

    # One wide load + one cast for the whole block (hoisted out of the loops).
    x = x_ref[...].astype(jnp.float32)                         # (Nb, C, R, L)
    planes = [x[:, ci] for ci in range(c)]                     # C slices, hoisted
    wts = [[w_ref[co, ci] for ci in range(c)] for co in range(c)]  # 16 SMEM reads, hoisted

    outs = []
    for co in range(c):                                        # C*C VPU broadcast-FMAs
        acc = wts[co][0] * planes[0]
        for ci in range(1, c):
            acc = acc + wts[co][ci] * planes[ci]
        outs.append(acc)

    # Single dense slab store for the whole block.
    o_ref[...] = jnp.stack(outs, axis=1).astype(o_ref.dtype)


def _choose_layout(n, hw):
    """Pick (lane, rows, nb, rows_tile) so each image is viewed as (rows, lane)."""
    # Lane width: prefer the widest 128-multiple factor that still yields >= 8
    # sublane-rows per image; for small images take the smallest 128-multiple
    # factor to maximize rows; otherwise fall back to the full (legal) width.
    lane = None
    for cand in (512, 256, 128):
        if hw % cand == 0 and hw // cand >= 8:
            lane = cand
            break
    if lane is None:
        for cand in (128, 256, 512):
            if hw % cand == 0:
                lane = cand
                break
    if lane is None:
        lane = hw                        # not a multiple of 128: full-width block
    rows = hw // lane

    # ~128K pixels per block (~2 MiB f32 at C=4): amortizes per-step overhead,
    # stays far under v7x's 32 MiB scoped VMEM with double-buffered in+out.
    max_block_px = 128 * 1024

    if rows >= 8:
        nb = 1
        cap = max(8, ((max_block_px // lane) // 8) * 8)        # multiple of 8
        rows_tile = rows if rows <= cap else cap
    else:
        # Tiny image: whole (rows, lane) plane per image, fold batches per block.
        nb = max(1, min(n, max_block_px // max(hw, 1)))
        rows_tile = rows                                       # full extent (legal)

    # v7x has 2 TensorCores: make sure a "parallel" axis has >= 2 grid points
    # whenever the problem can actually be split.
    n_blocks = -(-n // nb) * -(-rows // rows_tile)
    if n_blocks < 2:
        if nb > 1:
            nb = -(-nb // 2)
        elif rows_tile >= 16:
            rows_tile = max(8, ((rows_tile // 2) // 8) * 8)

    return lane, rows, nb, rows_tile


def color_transfer_inv(x_nchw, weight):
    """1x1 conv, no bias.  x_nchw: (N, C, H, W), weight: (C, C) = (out_ch, in_ch)."""
    n, c, h, w = x_nchw.shape
    assert weight.shape == (c, c)

    hw = h * w
    lane, rows, nb, rows_tile = _choose_layout(n, hw)

    x4 = x_nchw.reshape(n, c, rows, lane)        # pure reshape, no data movement
    grid = (pl.cdiv(n, nb), pl.cdiv(rows, rows_tile))

    itemsize = jnp.dtype(x_nchw.dtype).itemsize
    cost = pl.CostEstimate(
        flops=2 * n * hw * c * c,
        transcendentals=0,
        bytes_accessed=2 * n * hw * c * itemsize + c * c * 4,
    )

    blk = (nb, c, rows_tile, lane)
    out4 = pl.pallas_call(
        _conv1x1_kernel,
        out_shape=jax.ShapeDtypeStruct((n, c, rows, lane), x_nchw.dtype),
        grid_spec=pltpu.PrefetchScalarGridSpec(
            num_scalar_prefetch=0,
            grid=grid,
            in_specs=[
                # 16 weight scalars -> SMEM, read as scalars inside the kernel.
                pl.BlockSpec(memory_space=pltpu.MemorySpace.SMEM),
                # Dense (rows_tile, lane) pixel slab; batch images folded per block.
                pl.BlockSpec(blk, lambda b, j: (b, 0, j, 0)),
            ],
            out_specs=pl.BlockSpec(blk, lambda b, j: (b, 0, j, 0)),
        ),
        compiler_params=pltpu.CompilerParams(
            dimension_semantics=("parallel", "parallel"),
        ),
        cost_estimate=cost,
    )(weight, x4)

    return out4.reshape(n, c, h, w)              # pure reshape back to NCHW


if __name__ == "__main__":
    # n = 4 ** (cfg.px_num - 1) with assumed px_num = 2  ->  4 channels
    N, C, H, W = 2, 4, 16, 16

    key = jax.random.PRNGKey(0)
    kx, kw = jax.random.split(key)

    x = jax.random.normal(kx, (N, C, H, W), dtype=jnp.float32)

    # PyTorch Conv2d default init: U(-1/sqrt(fan_in), 1/sqrt(fan_in)), fan_in = C*1*1
    bound = 1.0 / math.sqrt(C)
    weight = jax.random.uniform(
        kw, (C, C), dtype=jnp.float32, minval=-bound, maxval=bound
    )

    out = jax.block_until_ready(color_transfer_inv(x, weight))

    # correctness check vs plain-JAX reference of the 1x1 conv
    ref = jnp.einsum("oc,nchw->nohw", weight, x)
    assert out.shape == (N, C, H, W)
    assert jnp.allclose(out, ref, atol=1e-5, rtol=1e-5)

    # also exercise the dense (rows >= 8) tiling path with a larger image
    x2 = jax.random.normal(jax.random.PRNGKey(1), (2, C, 64, 64), dtype=jnp.float32)
    out2 = jax.block_until_ready(color_transfer_inv(x2, weight))
    ref2 = jnp.einsum("oc,nchw->nohw", weight, x2)
    assert jnp.allclose(out2, ref2, atol=1e-5, rtol=1e-5)

    print("KERNEL_OK")
</pallas_src>

<mosaic_0001>
module attributes {stable_mosaic.version = 11 : i64} {
  func.func @_conv1x1_kernel(%arg0: i32, %arg1: i32, %arg2: memref<4x4xf32, #tpu.memory_space<smem>>, %arg3: memref<1x4x2x128xf32, #tpu.memory_space<vmem>>, %arg4: memref<1x4x2x128xf32, #tpu.memory_space<vmem>>) attributes {dimension_semantics = [#tpu.dimension_semantics<parallel>, #tpu.dimension_semantics<parallel>], iteration_bounds = array<i64: 2, 1>, scalar_prefetch = 0 : i64, scratch_operands = 0 : i64, tpu.core_type = #tpu.core_type<tc>, window_params = [{transform_indices = @transform_0, window_bounds = array<i64: 4, 4>}, {transform_indices = @transform_1, window_bounds = array<i64: 1, 4, 2, 128>}, {transform_indices = @transform_2, window_bounds = array<i64: 1, 4, 2, 128>}]} {
    %c0 = arith.constant 0 : index
    %c0_0 = arith.constant 0 : index
    %c0_1 = arith.constant 0 : index
    %c0_2 = arith.constant 0 : index
    %0 = vector.load %arg3[%c0, %c0_0, %c0_1, %c0_2] : memref<1x4x2x128xf32, #tpu.memory_space<vmem>>, vector<1x4x2x128xf32>
    %1 = vector.extract_strided_slice %0 {offsets = [0, 0, 0, 0], sizes = [1, 1, 2, 128], strides = [1, 1, 1, 1]} : vector<1x4x2x128xf32> to vector<1x1x2x128xf32>
    %2 = vector.shape_cast %1 : vector<1x1x2x128xf32> to vector<1x2x128xf32>
    %3 = vector.extract_strided_slice %0 {offsets = [0, 1, 0, 0], sizes = [1, 1, 2, 128], strides = [1, 1, 1, 1]} : vector<1x4x2x128xf32> to vector<1x1x2x128xf32>
    %4 = vector.shape_cast %3 : vector<1x1x2x128xf32> to vector<1x2x128xf32>
    %5 = vector.extract_strided_slice %0 {offsets = [0, 2, 0, 0], sizes = [1, 1, 2, 128], strides = [1, 1, 1, 1]} : vector<1x4x2x128xf32> to vector<1x1x2x128xf32>
    %6 = vector.shape_cast %5 : vector<1x1x2x128xf32> to vector<1x2x128xf32>
    %7 = vector.extract_strided_slice %0 {offsets = [0, 3, 0, 0], sizes = [1, 1, 2, 128], strides = [1, 1, 1, 1]} : vector<1x4x2x128xf32> to vector<1x1x2x128xf32>
    %8 = vector.shape_cast %7 : vector<1x1x2x128xf32> to vector<1x2x128xf32>
    %c0_3 = arith.constant 0 : index
    %c0_4 = arith.constant 0 : index
    %9 = memref.load %arg2[%c0_3, %c0_4] : memref<4x4xf32, #tpu.memory_space<smem>>
    %c0_5 = arith.constant 0 : index
    %c1 = arith.constant 1 : index
    %10 = memref.load %arg2[%c0_5, %c1] : memref<4x4xf32, #tpu.memory_space<smem>>
    %c0_6 = arith.constant 0 : index
    %c2 = arith.constant 2 : index
    %11 = memref.load %arg2[%c0_6, %c2] : memref<4x4xf32, #tpu.memory_space<smem>>
    %c0_7 = arith.constant 0 : index
    %c3 = arith.constant 3 : index
    %12 = memref.load %arg2[%c0_7, %c3] : memref<4x4xf32, #tpu.memory_space<smem>>
    %c1_8 = arith.constant 1 : index
    %c0_9 = arith.constant 0 : index
    %13 = memref.load %arg2[%c1_8, %c0_9] : memref<4x4xf32, #tpu.memory_space<smem>>
    %c1_10 = arith.constant 1 : index
    %c1_11 = arith.constant 1 : index
    %14 = memref.load %arg2[%c1_10, %c1_11] : memref<4x4xf32, #tpu.memory_space<smem>>
    %c1_12 = arith.constant 1 : index
    %c2_13 = arith.constant 2 : index
    %15 = memref.load %arg2[%c1_12, %c2_13] : memref<4x4xf32, #tpu.memory_space<smem>>
    %c1_14 = arith.constant 1 : index
    %c3_15 = arith.constant 3 : index
    %16 = memref.load %arg2[%c1_14, %c3_15] : memref<4x4xf32, #tpu.memory_space<smem>>
    %c2_16 = arith.constant 2 : index
    %c0_17 = arith.constant 0 : index
    %17 = memref.load %arg2[%c2_16, %c0_17] : memref<4x4xf32, #tpu.memory_space<smem>>
    %c2_18 = arith.constant 2 : index
    %c1_19 = arith.constant 1 : index
    %18 = memref.load %arg2[%c2_18, %c1_19] : memref<4x4xf32, #tpu.memory_space<smem>>
    %c2_20 = arith.constant 2 : index
    %c2_21 = arith.constant 2 : index
    %19 = memref.load %arg2[%c2_20, %c2_21] : memref<4x4xf32, #tpu.memory_space<smem>>
    %c2_22 = arith.constant 2 : index
    %c3_23 = arith.constant 3 : index
    %20 = memref.load %arg2[%c2_22, %c3_23] : memref<4x4xf32, #tpu.memory_space<smem>>
    %c3_24 = arith.constant 3 : index
    %c0_25 = arith.constant 0 : index
    %21 = memref.load %arg2[%c3_24, %c0_25] : memref<4x4xf32, #tpu.memory_space<smem>>
    %c3_26 = arith.constant 3 : index
    %c1_27 = arith.constant 1 : index
    %22 = memref.load %arg2[%c3_26, %c1_27] : memref<4x4xf32, #tpu.memory_space<smem>>
    %c3_28 = arith.constant 3 : index
    %c2_29 = arith.constant 2 : index
    %23 = memref.load %arg2[%c3_28, %c2_29] : memref<4x4xf32, #tpu.memory_space<smem>>
    %c3_30 = arith.constant 3 : index
    %c3_31 = arith.constant 3 : index
    %24 = memref.load %arg2[%c3_30, %c3_31] : memref<4x4xf32, #tpu.memory_space<smem>>
    %25 = vector.broadcast %9 : f32 to vector<1x2x128xf32>
    %26 = arith.mulf %25, %2 : vector<1x2x128xf32>
    %27 = vector.broadcast %10 : f32 to vector<1x2x128xf32>
    %28 = arith.mulf %27, %4 : vector<1x2x128xf32>
    %29 = arith.addf %26, %28 : vector<1x2x128xf32>
    %30 = vector.broadcast %11 : f32 to vector<1x2x128xf32>
    %31 = arith.mulf %30, %6 : vector<1x2x128xf32>
    %32 = arith.addf %29, %31 : vector<1x2x128xf32>
    %33 = vector.broadcast %12 : f32 to vector<1x2x128xf32>
    %34 = arith.mulf %33, %8 : vector<1x2x128xf32>
    %35 = arith.addf %32, %34 : vector<1x2x128xf32>
    %36 = vector.broadcast %13 : f32 to vector<1x2x128xf32>
    %37 = arith.mulf %36, %2 : vector<1x2x128xf32>
    %38 = vector.broadcast %14 : f32 to vector<1x2x128xf32>
    %39 = arith.mulf %38, %4 : vector<1x2x128xf32>
    %40 = arith.addf %37, %39 : vector<1x2x128xf32>
    %41 = vector.broadcast %15 : f32 to vector<1x2x128xf32>
    %42 = arith.mulf %41, %6 : vector<1x2x128xf32>
    %43 = arith.addf %40, %42 : vector<1x2x128xf32>
    %44 = vector.broadcast %16 : f32 to vector<1x2x128xf32>
    %45 = arith.mulf %44, %8 : vector<1x2x128xf32>
    %46 = arith.addf %43, %45 : vector<1x2x128xf32>
    %47 = vector.broadcast %17 : f32 to vector<1x2x128xf32>
    %48 = arith.mulf %47, %2 : vector<1x2x128xf32>
    %49 = vector.broadcast %18 : f32 to vector<1x2x128xf32>
    %50 = arith.mulf %49, %4 : vector<1x2x128xf32>
    %51 = arith.addf %48, %50 : vector<1x2x128xf32>
    %52 = vector.broadcast %19 : f32 to vector<1x2x128xf32>
    %53 = arith.mulf %52, %6 : vector<1x2x128xf32>
    %54 = arith.addf %51, %53 : vector<1x2x128xf32>
    %55 = vector.broadcast %20 : f32 to vector<1x2x128xf32>
    %56 = arith.mulf %55, %8 : vector<1x2x128xf32>
    %57 = arith.addf %54, %56 : vector<1x2x128xf32>
    %58 = vector.broadcast %21 : f32 to vector<1x2x128xf32>
    %59 = arith.mulf %58, %2 : vector<1x2x128xf32>
    %60 = vector.broadcast %22 : f32 to vector<1x2x128xf32>
    %61 = arith.mulf %60, %4 : vector<1x2x128xf32>
    %62 = arith.addf %59, %61 : vector<1x2x128xf32>
    %63 = vector.broadcast %23 : f32 to vector<1x2x128xf32>
    %64 = arith.mulf %63, %6 : vector<1x2x128xf32>
    %65 = arith.addf %62, %64 : vector<1x2x128xf32>
    %66 = vector.broadcast %24 : f32 to vector<1x2x128xf32>
    %67 = arith.mulf %66, %8 : vector<1x2x128xf32>
    %68 = arith.addf %65, %67 : vector<1x2x128xf32>
    %69 = vector.shape_cast %35 : vector<1x2x128xf32> to vector<1x1x2x128xf32>
    %70 = vector.shape_cast %46 : vector<1x2x128xf32> to vector<1x1x2x128xf32>
    %71 = vector.shape_cast %57 : vector<1x2x128xf32> to vector<1x1x2x128xf32>
    %72 = vector.shape_cast %68 : vector<1x2x128xf32> to vector<1x1x2x128xf32>
    %73 = tpu.concatenate %69, %70, %71, %72 in 1 : vector<1x1x2x128xf32>, vector<1x1x2x128xf32>, vector<1x1x2x128xf32>, vector<1x1x2x128xf32> -> vector<1x4x2x128xf32>
    %c0_32 = arith.constant 0 : index
    %c0_33 = arith.constant 0 : index
    %c0_34 = arith.constant 0 : index
    %c0_35 = arith.constant 0 : index
    %74 = vector.load %arg4[%c0_32, %c0_33, %c0_34, %c0_35] : memref<1x4x2x128xf32, #tpu.memory_space<vmem>>, vector<1x4x2x128xf32>
    tpu.vector_store %arg4[%c0_32, %c0_33, %c0_34, %c0_35], %73 {strides = array<i32>} : memref<1x4x2x128xf32, #tpu.memory_space<vmem>>, vector<1x4x2x128xf32>,
    return
  }
  func.func @transform_0(%arg0: i32, %arg1: i32) -> (i32, i32) {
    %c0_i32 = arith.constant 0 : i32
    %c0_i32_0 = arith.constant 0 : i32
    %c0_i32_1 = arith.constant 0 : i32
    return %c0_i32, %c0_i32_0 : i32, i32
  }
  func.func @transform_1(%arg0: i32, %arg1: i32) -> (i32, i32, i32, i32) {
    %c0_i32 = arith.constant 0 : i32
    %c0_i32_0 = arith.constant 0 : i32
    %c0_i32_1 = arith.constant 0 : i32
    return %arg0, %c0_i32, %arg1, %c0_i32_0 : i32, i32, i32, i32
  }
  func.func @transform_2(%arg0: i32, %arg1: i32) -> (i32, i32, i32, i32) {
    %c0_i32 = arith.constant 0 : i32
    %c0_i32_0 = arith.constant 0 : i32
    %c0_i32_1 = arith.constant 0 : i32
    return %arg0, %c0_i32, %arg1, %c0_i32_0 : i32, i32, i32, i32
  }
}

</mosaic_0001>

<bundles_post_ra>
// kernel: tpu_custom_call.1
= control target key start
LH: loop header
LB: loop body
LE: loop exit
PB: predicated region body
PF: predicated region fallthrough
CT: control target
= control target key end

     0   :  { %7 = vsyncpa [#allocation5], 0  ;;  %s803_s0 = inlined_call_operand.hbm [shape: f32[4,4], index: 0, kind: input, shape index: {}]   ;;  %s804_s1 = inlined_call_operand.hbm [shape: f32[2,4,2,128], index: 1, kind: input, shape index: {}]   ;;  %s805_s2 = inlined_call_operand.hbm [shape: f32[2,4,2,128], index: 2, kind: output, shape index: {}]  }
   0x1   :  { %8 = vsyncpa [#allocation3], 0 }
   0x2   :  { %10 = vsyncpa [#allocation3 + $0x1], 0 }
   0x3   :  { %11 = vsyncpa [#allocation4], 0 }
   0x4   :  { %13 = vsyncpa [#allocation4 + $0x1], 0  ;;  %s641_s9 = smov 0   ;;  %s643_s10 = smov 0  }
   0x5   :  { %s645_s11 = smov 0   ;;  %s647_s12 = smov 0  }
   0x6   :  { %s649_s13 = smov 0   ;;  %s651_s14 = smov 0  }
   0x7 LB: > { %s377_s15 = sadd.s32 4294967295, %s619_s14   ;;  %s378_s16 = sadd.s32 4294967294, %s619_s14   ;;  %s619_s14 = sphi %s651_s14, %s19_s14   ;;  %s615_s13 = sphi %s649_s13, %s817_s13   ;;  %s611_s12 = sphi %s647_s12, %s816_s12   ;;  %s607_s11 = sphi %s645_s11, %s815_s11   ;;  %s603_s10 = sphi %s643_s10, %s814_s10   ;;  %s599_s9 = sphi %s641_s9, %s813_s9  }
   0x8   : > { %s61_s17 = sadd.s32 1, %s607_s11  ;;  %p68_p0 = scmp.ne.s32.totalorder %s607_s11, %s603_s10 }
   0x9   : > { %p69_p1 = scmp.eq.s32.totalorder %s619_s14, 0  ;;  %p74_p2 = scmp.ne.s32.totalorder %s603_s10, %s599_s9 }
   0xa   : > { %p679_p3 = scmp.eq.s32.totalorder %s377_s15, 0  ;;  %p100_p4 = scmp.eq.s32.totalorder %s377_s15, 1 }
   0xb   : > { %p683_p5 = por %p69_p1, %p68_p0  ;;  %p106_p6 = scmp.eq.s32.totalorder %s378_s16, 1 }
   0xc   : > { %p689_p7 = por %p679_p3, %p74_p2  ;;  %p693_p8 = por %p100_p4, %p68_p0 }
   0xd   : > { %p697_p9 = por %p106_p6, %p74_p2  ;;  %p379_p10 = scmp.ge.s32.totalorder %s619_s14, 1 }
   0xe   : > { %p113_p11 = scmp.lt.s32.totalorder %s619_s14, 3  ;;  %s125_s25 = sshll.u32 %s803_s0, 4  ;;  %s126_s25 = int_to_ptr.hbm [resolvable:$true] %s125_s25 }
   0xf   : > { %p381_p13 = scmp.ge.s32.totalorder %s619_s14, 2  ;;  %p432_p0 = scmp.lt.s32.totalorder %s619_s14, 2 }
  0x10   : > { %p706_p12 = pnand %p379_p10, %p113_p11  ;;  %s31_s28 = sadd.s32 1, %s615_s13 }
  0x11   : > { %p716_p2 = pnand %p432_p0, %p683_p5  ;;  %p33_p6 = scmp.ge.s32.totalorder %s31_s28, 2 }
  0x12   : > { %p419_p1 = pneg %p706_p12  ;;  %s136_s29 = sand.u32 1, %s607_s11  }
  0x13   : > { %s621_s30 = smov [#allocation2]   ;;  %s819_s28 = smov (%p33_p6, %s31_s28), 0 }
  0x14   : > { %p420_p4 = pnand %p419_p1, %p679_p3  ;;  %s382_s3 = sshll.u32 %s136_s29, 3 }
  0x15   : > { %s56_s4 = ssub.s32 %s615_s13, %s819_s28  ;;  %s409_s5 = sshll.u32 %s615_s13, 3 }
  0x16   : > { %422 = dma.hbm_to_smem (!%p420_p4), %s126_s25, 64, %s621_s30, [#allocation5]  }
  0x17   : > { %p59_p10 = scmp.eq.s32.totalorder %s56_s4, 0  ;;  %s146_s8 = scalar_lea.hbm %s804_s1, %s409_s5 }
  0x18   : > { %s140_s15 = scalar_lea.vmem [#allocation6], %s382_s3  ;;  %s147_s23 = sshll.u32 %s146_s8, 4  ;;  %s148_s23 = int_to_ptr.hbm [resolvable:$true] %s147_s23 }
  0x19   : > { %s149_s16 = sshll.u32 %s140_s15, 4  ;;  %s137_s24 = scalar_lea.sflag [#allocation3], %s136_s29  ;;  %s150_s16 = int_to_ptr.vmem [resolvable:$true] %s149_s16 }
  0x1a   : > { %s735_s19 = scalar_select %p59_p10, %s607_s11, %s61_s17  }
  0x1b   : > { %s622_s25 = smov 32   ;;  %s623_s30 = smov 2  }
  0x1c   : > { %426 = dma.hbm_to_vmem [thread:$0]  (!%p716_p2), %s148_s23, 128, %s150_s16, %s137_s24, %s622_s25, %s622_s25, %s623_s30  }
  0x1d   : > { %161 = sbr.rel (%p706_p12) target bundleno = 73 (0x49), region = 28 }
  0x22   : > { %586 = dma.done.wait (%p679_p3), [#allocation5], 64  }
  0x23   : > { %588 = vsyncadd (%p679_p3), [#allocation5], 4294967232  ;;  %s746_s17 = sand.u32 1, %s603_s10  }
  0x24   : > { %s387_s29 = sshll.u32 %s746_s17, 3  ;;  %s169_s3 = scalar_lea.sflag [#allocation3], %s746_s17 }
  0x25   : > { %s172_s27 = scalar_lea.vmem [#allocation6], %s387_s29 }
  0x26   : > { %590 = dma.done.wait (%p689_p7), %s169_s3, 128  }
  0x27   : > { %592 = vsyncadd (%p689_p7), %s169_s3, 4294967168 }
  0x28   : > { %178 = sfence }
  0x29   : > { %s199_s26 = sld [smem:[#allocation2]]  ;;  %v195_v0 = vld [vmem:[%s172_s27] sm:$0x3]  ;;  %v196_v1 = vld [vmem:[%s172_s27 + $0x2] sm:$0x3] }
  0x2a   : > { %s389_s18 = sld [smem:[#allocation2 + $0x1]]  ;;  %v197_v2 = vld [vmem:[%s172_s27 + $0x4] sm:$0x3]  ;;  %v198_v4 = vld [vmem:[%s172_s27 + $0x6] sm:$0x3] }
  0x2b   : > { %s390_s4 = sld [smem:[#allocation2 + $0x2]] }
  0x2c   : > { %s391_s5 = sld [smem:[#allocation2 + $0x3]] }
  0x2d   : > { %s392_s6 = sld [smem:[#allocation2 + $0x80]] }
  0x2e   : > { %s393_s7 = sld [smem:[#allocation2 + $0x81]] }
  0x2f   : > { %v215_v3 = vstv %s199_s26  ;;  %s394_s8 = sld [smem:[#allocation2 + $0x82]]  ;;  %s758_s26 = scalar_lea.vmem [#allocation7], %s387_s29 }
  0x30   : > { %v216_v5 = vmul.f32 %v215_v3, %v195_v0  ;;  %v217_v6 = vstv %s389_s18  ;;  %s395_s15 = sld [smem:[#allocation2 + $0x83]]  ;;  %s410_s18 = sshll.u32 %s611_s12, 3 }
  0x31   : > { %v218_v7 = vmul.f32 %v217_v6, %v196_v1  ;;  %v220_v8 = vstv %s390_s4  ;;  %s396_s20 = sld [smem:[#allocation2 + $0x100]]  ;;  %s277_s12 = sshll.u32 %s758_s26, 4  ;;  %s278_s12 = int_to_ptr.vmem [resolvable:$true] %s277_s12 }
  0x32   : > { %v221_v9 = vmul.f32 %v220_v8, %v197_v2  ;;  %v223_v10 = vstv %s391_s5  ;;  %s397_s16 = sld [smem:[#allocation2 + $0x101]]  ;;  %s276_s5 = scalar_lea.hbm %s805_s2, %s410_s18 }
  0x33   : > { %v219_v11 = vadd.f32 %v218_v7, %v216_v5  ;;  %v224_v12 = vmul.f32 %v223_v10, %v198_v4  ;;  %v226_v13 = vstv %s392_s6  ;;  %s398_s23 = sld [smem:[#allocation2 + $0x102]]  ;;  %s279_s6 = sshll.u32 %s276_s5, 4  ;;  %s280_s6 = int_to_ptr.hbm [resolvable:$true] %s279_s6 }
  0x34   : > { %v227_v14 = vmul.f32 %v226_v13, %v195_v0  ;;  %v228_v15 = vstv %s393_s7  ;;  %s399_s24 = sld [smem:[#allocation2 + $0x103]]  ;;  %s264_s7 = scalar_lea.sflag [#allocation4], %s746_s17 }
  0x35   : > { %v222_v16 = vadd.f32 %v221_v9, %v219_v11  ;;  %v229_v17 = vmul.f32 %v228_v15, %v196_v1  ;;  %v231_v18 = vstv %s394_s8  ;;  %s400_s25 = sld [smem:[#allocation2 + $0x180]]  ;;  %s547_s8 = sshra.s32 %s280_s6, 4  ;;  %s548_s8 = int_to_ptr.hbm [resolvable:$true] %s547_s8 }
  0x36   : > { %v232_v19 = vmul.f32 %v231_v18, %v197_v2  ;;  %v234_v20 = vstv %s395_s15  ;;  %s401_s30 = sld [smem:[#allocation2 + $0x181]]  ;;  %s549_s15 = scalar_lea.hbm %s548_s8, 8 }
  0x37   : > { %v225_v21 = vadd.f32 %v224_v12, %v222_v16  ;;  %v230_v22 = vadd.f32 %v229_v17, %v227_v14  ;;  %v235_v23 = vmul.f32 %v234_v20, %v198_v4  ;;  %v237_v24 = vstv %s396_s20  ;;  %s402_s3 = sld [smem:[#allocation2 + $0x182]]  ;;  %p550_p3 = scmp.ne.s32.totalorder %s548_s8, %s549_s15 }
  0x38   : > { %v238_v25 = vmul.f32 %v237_v24, %v195_v0  ;;  %v239_v26 = vstv %s397_s16  ;;  %s403_s27 = sld [smem:[#allocation2 + $0x183]]  ;;  %p554_p11 = scmp.lt.s32.totalorder %s548_s8, %s805_s2 }
  0x39   : > { %259 = vst [vmem:[%s758_s26] sm:$0x3] %v225_v21  ;;  %v233_v27 = vadd.f32 %v232_v19, %v230_v22  ;;  %v240_v28 = vmul.f32 %v239_v26, %v196_v1  ;;  %v242_v29 = vstv %s398_s23  ;;  %p551_p5 = pnand %p550_p3, %p693_p8  ;;  %s553_s23 = scalar_lea.hbm %s805_s2, 16 }
  0x3a   : > { %v243_v30 = vmul.f32 %v242_v29, %v197_v2  ;;  %v245_v31 = vstv %s399_s24  ;;  %p555_p12 = scmp.lt.s32.totalorder %s553_s23, %s549_s15 }
  0x3b   : > { %v236_v32 = vadd.f32 %v235_v23, %v233_v27  ;;  %v241_v33 = vadd.f32 %v240_v28, %v238_v25  ;;  %v246_v34 = vmul.f32 %v245_v31, %v198_v4  ;;  %v248_v35 = vstv %s400_s25  ;;  %p552_p7 = pneg %p551_p5 }
  0x3c   : > { %v249_v36 = vmul.f32 %v248_v35, %v195_v0  ;;  %v250_v37 = vstv %s401_s30  ;;  %p556_p0 = por %p555_p12, %p554_p11 }
  0x3d   : > { %260 = vst [vmem:[%s758_s26 + $0x2] sm:$0x3] %v236_v32  ;;  %v244_v38 = vadd.f32 %v243_v30, %v241_v33  ;;  %v251_v39 = vmul.f32 %v250_v37, %v196_v1  ;;  %v253_v40 = vstv %s402_s3 }
  0x3e   : > { %v254_v41 = vmul.f32 %v253_v40, %v197_v2  ;;  %v256_v42 = vstv %s403_s27  ;;  %p557_p1 = pnand %p556_p0, %p552_p7 }
  0x3f   : > { %v247_v43 = vadd.f32 %v246_v34, %v244_v38  ;;  %v252_v44 = vadd.f32 %v251_v39, %v249_v36  ;;  %v257_v45 = vmul.f32 %v256_v42, %v198_v4 }
  0x41   : > { %261 = vst [vmem:[%s758_s26 + $0x4] sm:$0x3] %v247_v43  ;;  %v255_v46 = vadd.f32 %v254_v41, %v252_v44 }
  0x43   : > { %v258_v47 = vadd.f32 %v257_v45, %v255_v46 }
  0x45   : > { %262 = vst [vmem:[%s758_s26 + $0x6] sm:$0x3] %v258_v47 }
  0x46   : > { %560 = shalt.err (!%p557_p1)
}
  0x47   : > { %s624_s17 = smov 32   ;;  %s625_s30 = smov 2  }
  0x48   : > { %417 = dma.vmem_to_hbm [thread:$0]  (%p693_p8), %s278_s12, 128, %s280_s6, %s264_s7, %s624_s17, %s624_s17, %s625_s30  }
  0x49 PF: > { %s294_s3 = sand.u32 1, %s599_s9   ;;  %p428_p2 = pnand %p381_p13, %p697_p9 }
  0x4a   : > { %s295_s27 = scalar_lea.sflag [#allocation4], %s294_s3 }
  0x4b   : > { %p429_p4 = pneg %p428_p2 }
  0x4d   : > { %594 = dma.done.wait (%p429_p4), %s295_s27, 128  }
  0x4e   : > { %596 = vsyncadd (%p429_p4), %s295_s27, 4294967168  ;;  %s19_s14 = sadd.s32 1, %s619_s14   ;;  %s813_s9 = smov %s603_s10 }
  0x4f   : > { %p16_p6 = scmp.ge.s32.totalorder %s19_s14, 4   ;;  %s814_s10 = smov %s607_s11 }
  0x50   : > { %s815_s11 = smov %s735_s19  ;;  %s816_s12 = smov %s615_s13 }
  0x51   : > { %s817_s13 = smov %s819_s28  ;;  %18 = sbr.rel (!%p16_p6) target bundleno = 7 (0x7), region = 78 }
  0x56   :  { %301 = vsyncpa [#allocation3], 1 }
  0x57   :  { %303 = vsyncpa [#allocation3 + $0x1], 1 }
  0x58   :  { %304 = vsyncpa [#allocation4], 1 }
  0x59   :  { %306 = vsyncpa [#allocation4 + $0x1], 1 }
  0x5a   :  { %307 = vsyncpa [#allocation5], 1 }
  0x5b   :  { %309 = vsyncpa [#allocation5 + $0x1], 1 }

</bundles_post_ra>
